<compile_context>
chip_gen: v6e
topology: v6e:2x2x1
jax: 0.10.0
libtpu: 0.0.40
codegen_flags: <defaults>
</compile_context>

<pallas_src>
import jax
import jax.numpy as jnp
from jax.experimental import pallas as pl
from jax.experimental.pallas import tpu as pltpu


def _normalize_kernel(const_ref, img_ref, out_ref):
    # const_ref: (row_tile, 2) f32 — column 0 = per-row mean, column 1 = per-row 1/std.
    # img_ref / out_ref: (row_tile, col_tile) image tile (lane-dense last dim).
    x = img_ref[...].astype(jnp.float32)
    mean = const_ref[:, 0:1]      # (row_tile, 1) -> broadcasts along the lane axis
    inv_std = const_ref[:, 1:2]   # reciprocal precomputed: pure VALU sub + mul
    out_ref[...] = ((x - mean) * inv_std).astype(out_ref.dtype)


def _round_up(x, m):
    return ((x + m - 1) // m) * m


def normalization_forward(img, mean, std, *, donate_img=False):
    """(img - mean.view(-1,1,1)) / std.view(-1,1,1) for an NCHW image batch."""
    N, C, H, W = img.shape
    assert mean.shape == (C,) and std.shape == (C,)

    NC, HW = N * C, H * W

    # Lane-dense 2D view: rows = (n, c) pairs, cols = flattened spatial positions.
    # No dtype cast here — narrow inputs stream at native width, cast happens in-kernel.
    img2d = img.reshape(NC, HW)

    # PyTorch semantics: result of (img - float) / float is float. Keep float inputs'
    # dtype, promote integer inputs to float32.
    out_dtype = img.dtype if jnp.issubdtype(img.dtype, jnp.floating) else jnp.float32

    # Per-row constants packed into a single (NC, 2) f32 array (row = n*C + c).
    mean_rows = jnp.tile(jnp.asarray(mean, jnp.float32), N)
    inv_std_rows = jnp.tile(1.0 / jnp.asarray(std, jnp.float32), N)
    consts = jnp.stack([mean_rows, inv_std_rows], axis=-1)  # (NC, 2)

    # Sublane granularity follows the packed layout of the image dtype.
    itemsize = jnp.dtype(img.dtype).itemsize
    sub = {1: 32, 2: 16}.get(itemsize, 8)

    # Fixed large tiles (~8 MiB f32 per image block); clamp to the (rounded-up) array
    # extents for small inputs. Partial edge blocks are masked by Pallas (pl.cdiv grid).
    ROW_TILE, COL_TILE = 512, 4096
    row_tile = min(ROW_TILE, _round_up(NC, sub))
    col_tile = min(COL_TILE, _round_up(HW, 128))

    row_blocks = pl.cdiv(NC, row_tile)
    col_blocks = pl.cdiv(HW, col_tile)

    if row_blocks == 1 and col_blocks > 1:
        # Put the many-step column axis first so v7x megacore sharding has work on
        # both TensorCores even when NC is tiny. No-op on single-core v5e/v6e.
        grid = (col_blocks, row_blocks)
        img_map = lambda j, i: (i, j)
        const_map = lambda j, i: (i, 0)
    else:
        grid = (row_blocks, col_blocks)
        img_map = lambda i, j: (i, j)
        const_map = lambda i, j: (i, 0)

    # Optional buffer donation (only when the output dtype matches the input dtype).
    aliases = {1: 0} if (donate_img and out_dtype == img.dtype) else {}

    out2d = pl.pallas_call(
        _normalize_kernel,
        out_shape=jax.ShapeDtypeStruct((NC, HW), out_dtype),
        grid_spec=pltpu.PrefetchScalarGridSpec(
            num_scalar_prefetch=0,
            grid=grid,
            in_specs=[
                pl.BlockSpec((row_tile, 2), const_map),         # packed mean / 1/std
                pl.BlockSpec((row_tile, col_tile), img_map),    # image tile
            ],
            out_specs=pl.BlockSpec((row_tile, col_tile), img_map),
        ),
        compiler_params=pltpu.CompilerParams(
            dimension_semantics=("parallel", "parallel"),
            # 2x 8 MiB in + 2x 8 MiB out double-buffers + constants ~= 33 MiB:
            # above the 16/32 MiB scoped defaults, below v7x's 64 MiB physical VMEM.
            vmem_limit_bytes=48 << 20,
        ),
        input_output_aliases=aliases,
    )(consts, img2d)

    return out2d.reshape(N, C, H, W)


if __name__ == "__main__":
    key = jax.random.PRNGKey(0)
    k_img, _ = jax.random.split(key)

    N, C, H, W = 2, 4, 16, 16
    img = jax.random.normal(k_img, (N, C, H, W), dtype=jnp.float32)

    # Deterministic per-channel normalization constants (synthetic, not a checkpoint).
    mean = jnp.array([0.485, 0.456, 0.406, 0.5], dtype=jnp.float32)[:C]
    std = jnp.array([0.229, 0.224, 0.225, 0.25], dtype=jnp.float32)[:C]

    out = normalization_forward(img, mean, std)
    out = jax.block_until_ready(out)

    # Reference check against plain-JAX broadcasting semantics (exact divide).
    ref = (img - mean.reshape(-1, 1, 1)) / std.reshape(-1, 1, 1)
    assert out.shape == img.shape
    assert out.dtype == jnp.float32
    # Kernel uses precomputed reciprocal multiply -> allow a couple of ulps vs divide.
    assert jnp.allclose(out, ref, atol=1e-5, rtol=1e-5)

    print("KERNEL_OK")
</pallas_src>

<mosaic_0001>
module attributes {stable_mosaic.version = 11 : i64} {
  func.func @_normalize_kernel(%arg0: i32, %arg1: i32, %arg2: memref<8x2xf32, #tpu.memory_space<vmem>>, %arg3: memref<8x256xf32, #tpu.memory_space<vmem>>, %arg4: memref<8x256xf32, #tpu.memory_space<vmem>>) attributes {dimension_semantics = [#tpu.dimension_semantics<parallel>, #tpu.dimension_semantics<parallel>], iteration_bounds = array<i64: 1, 1>, scalar_prefetch = 0 : i64, scratch_operands = 0 : i64, tpu.core_type = #tpu.core_type<tc>, window_params = [{transform_indices = @transform_0, window_bounds = array<i64: 8, 2>}, {transform_indices = @transform_1, window_bounds = array<i64: 8, 256>}, {transform_indices = @transform_2, window_bounds = array<i64: 8, 256>}]} {
    %c0 = arith.constant 0 : index
    %c0_0 = arith.constant 0 : index
    %0 = vector.load %arg3[%c0, %c0_0] : memref<8x256xf32, #tpu.memory_space<vmem>>, vector<8x256xf32>
    %c0_1 = arith.constant 0 : index
    %c0_2 = arith.constant 0 : index
    %1 = vector.load %arg2[%c0_1, %c0_2] : memref<8x2xf32, #tpu.memory_space<vmem>>, vector<8x1xf32>
    %c0_3 = arith.constant 0 : index
    %c1 = arith.constant 1 : index
    %2 = vector.load %arg2[%c0_3, %c1] : memref<8x2xf32, #tpu.memory_space<vmem>>, vector<8x1xf32>
    %3 = vector.broadcast %1 : vector<8x1xf32> to vector<8x256xf32>
    %4 = arith.subf %0, %3 : vector<8x256xf32>
    %5 = vector.broadcast %2 : vector<8x1xf32> to vector<8x256xf32>
    %6 = arith.mulf %4, %5 : vector<8x256xf32>
    %c0_4 = arith.constant 0 : index
    %c0_5 = arith.constant 0 : index
    %7 = vector.load %arg4[%c0_4, %c0_5] : memref<8x256xf32, #tpu.memory_space<vmem>>, vector<8x256xf32>
    tpu.vector_store %arg4[%c0_4, %c0_5], %6 {strides = array<i32>} : memref<8x256xf32, #tpu.memory_space<vmem>>, vector<8x256xf32>,
    return
  }
  func.func @transform_0(%arg0: i32, %arg1: i32) -> (i32, i32) {
    %c0_i32 = arith.constant 0 : i32
    %c0_i32_0 = arith.constant 0 : i32
    return %arg0, %c0_i32 : i32, i32
  }
  func.func @transform_1(%arg0: i32, %arg1: i32) -> (i32, i32) {
    %c0_i32 = arith.constant 0 : i32
    return %arg0, %arg1 : i32, i32
  }
  func.func @transform_2(%arg0: i32, %arg1: i32) -> (i32, i32) {
    %c0_i32 = arith.constant 0 : i32
    return %arg0, %arg1 : i32, i32
  }
}

</mosaic_0001>

<bundles_post_ra>
// kernel: tpu_custom_call.1
= control target key start
LH: loop header
LB: loop body
LE: loop exit
PB: predicated region body
PF: predicated region fallthrough
CT: control target
= control target key end

     0   :  { %7 = vsyncpa [#allocation3], 0  ;;  %s135_s0 = inlined_call_operand.vmem [shape: f32[8,2], index: 0, kind: input, shape index: {}]   ;;  %s136_s1 = inlined_call_operand.hbm [shape: f32[8,256], index: 1, kind: input, shape index: {}]   ;;  %s137_s2 = inlined_call_operand.hbm [shape: f32[8,256], index: 2, kind: output, shape index: {}]  }
   0x1   :  { %8 = vsyncpa [#allocation4], 0  ;;  %s107_s9 = smov [#allocation2]  }
   0x2   :  { %s17_s10 = sshll.u32 %s107_s9, 4  ;;  %s18_s10 = int_to_ptr.vmem [resolvable:$true] %s17_s10 }
   0x3   :  { %s71_s11 = scalar_lea.vmem %s18_s10, 256  ;;  %p76_p1 = scmp.lt.s32.totalorder %s18_s10, %s18_s10 }
   0x4   :  { %p72_p0 = scmp.ne.s32.totalorder %s18_s10, %s71_s11  ;;  %p77_p2 = scmp.lt.s32.totalorder %s71_s11, %s71_s11 }
   0x6   :  { %p78_p3 = por %p77_p2, %p76_p1 }
   0x8   :  { %p79_p4 = pnand %p78_p3, %p72_p0 }
   0xa   :  { %82 = shalt.err (!%p79_p4)
}
   0xb   :  { %20 = dma.hbm_to_vmem [thread:$0]  %s136_s1, 256, %s18_s10, [#allocation3]  }
   0xc   :  { %103 = dma.done.wait [#allocation3], 256  }
   0xd   :  { %104 = vsyncadd [#allocation3], 4294967040  ;;  %v108_v0 = vmov 0   ;;  %v26_v1 = vld [vmem:[%s135_s0] sm:$0xff]  ;;  %v109_v2 = vmov 1   ;;  %v25_v5 = vld [vmem:[#allocation2 + $0x8] sm:$0xff] }
   0xe   :  { %61 = vset.pattern.permute.xlu0 %v108_v0  ;;  %v24_v4 = vld [vmem:[#allocation2] sm:$0xff]  ;;  %s110_s16 = smov [#allocation5]  }
   0xf   :  { %29 = vperm.xlu0 %61, %v26_v1   ;;  %s48_s17 = sshll.u32 %s110_s16, 4  ;;  %s49_s17 = int_to_ptr.vmem [resolvable:$true] %s48_s17 }
  0x10   :  { %s83_s1 = scalar_lea.vmem %s49_s17, 256  ;;  %p88_p6 = scmp.lt.s32.totalorder %s49_s17, %s49_s17 }
  0x11   :  { %p84_p5 = scmp.ne.s32.totalorder %s49_s17, %s83_s1  ;;  %p89_p7 = scmp.lt.s32.totalorder %s83_s1, %s83_s1 }
  0x13   :  { %62 = vset.pattern.permute.xlu0 %v109_v2  ;;  %p90_p8 = por %p89_p7, %p88_p6 }
  0x14   :  { %35 = vperm.xlu0 %62, %v26_v1  }
  0x15   :  { %p91_p9 = pnand %p90_p8, %p84_p5 }
  0x8a   :  { %v30_v3 = vpop.permute.xlu0 %29 }
  0x8b   :  { %v32_v6 = vsub.f32 %v24_v4, %v30_v3  ;;  %v33_v7 = vsub.f32 %v25_v5, %v30_v3 }
  0x8f   :  { %v36_v8 = vpop.permute.xlu0 %35 }
  0x90   :  { %v38_v9 = vmul.f32 %v36_v8, %v32_v6  ;;  %v39_v10 = vmul.f32 %v36_v8, %v33_v7 }
  0x92   :  { %40 = vst [vmem:[#allocation5] sm:$0xff] %v38_v9  ;;  %41 = vst [vmem:[#allocation5 + $0x8] sm:$0xff] %v39_v10 }
  0x93   :  { %94 = shalt.err (!%p91_p9)
}
  0x94   :  { %51 = dma.vmem_to_hbm [thread:$0]  %s49_s17, 256, %s137_s2, [#allocation4]  }
  0x95   :  { %105 = dma.done.wait [#allocation4], 256  }
  0x96   :  { %106 = vsyncadd [#allocation4], 4294967040 }
  0x97   :  { %55 = vsyncpa [#allocation3], 1 }
  0x98   :  { %56 = vsyncpa [#allocation4], 1 }

</bundles_post_ra>
